<compile_context>
chip_gen: v7x
topology: tpu7x:2x2x1
jax: 0.10.0
libtpu: 0.0.40
codegen_flags: <defaults>
</compile_context>

<pallas_src>
import jax
import jax.numpy as jnp
from jax.experimental import pallas as pl
from jax.experimental.pallas import tpu as pltpu

LN_EPS = 1e-5


def _round_up(x, m):
    return ((x + m - 1) // m) * m


def _default_matmul_dtype(c):
    # bf16 MXU operands pay off on v6e/v7x at moderate/large C; keep f32 on
    # v5e (no bf16 VPU; HBM-bound at these sizes) and for small C.
    try:
        kind = jax.devices()[0].device_kind.lower()
    except Exception:
        kind = ""
    if c >= 256 and ("v6" in kind or "v7" in kind):
        return jnp.bfloat16
    return jnp.float32


def _vmem_cap_bytes():
    # ~3/4 of physical VMEM: ~96 MiB on v5e/v6e (128 MiB), ~48 MiB on v7x (64 MiB).
    try:
        phys = int(pltpu.get_tpu_info().vmem_capacity_bytes)
    except Exception:
        phys = 64 * 1024 * 1024          # conservative fallback (v7x-sized)
    return max(32 * 1024 * 1024, (phys * 3) // 4)


def _vmem_estimate_bytes(tm, c, tn, x_itemsize, w_itemsize):
    io = 2 * tm * c * x_itemsize         # x tile, double-buffered
    io += 2 * tm * tn * x_itemsize       # out tile, double-buffered
    io += 2 * c * tn * w_itemsize        # W' strip (assume double-buffered)
    io += 2 * 8 * max(tn, 128) * 4       # b' strip (padded to a sublane tile)
    # in-kernel temporaries: x/xc/xn in f32, the matmul-dtype cast, y in f32
    tmp = (3 * 4 + w_itemsize) * tm * c + 4 * tm * tn
    return io + tmp


def prenorm_kernel(x_ref, w_ref, b_ref, o_ref):
    # x_ref: (tm, C) row tile with the FULL channel extent, so the LayerNorm
    # statistics are exact (no channel padding / masking needed).
    # w_ref: (C, tn) folded-weight strip.  b_ref: (1, tn).  o_ref: (tm, tn).
    x = x_ref[...].astype(jnp.float32)
    inv_c = 1.0 / x_ref.shape[-1]

    # --- LayerNorm over the last axis: two-pass, biased variance, f32 ---
    mean = jnp.sum(x, axis=-1, keepdims=True) * inv_c
    xc = x - mean
    var = jnp.sum(xc * xc, axis=-1, keepdims=True) * inv_c
    xn = xc * jax.lax.rsqrt(var + LN_EPS)   # gamma/beta folded into W'/b'

    # --- fn: Linear  (y = xn @ W' + b') on the MXU, f32 accumulation ---
    y = jnp.dot(xn.astype(w_ref.dtype), w_ref[...],
                preferred_element_type=jnp.float32)
    o_ref[...] = (y + b_ref[...]).astype(o_ref.dtype)


def fold_prenorm_linear_params(gamma, beta, w_t, b, *, matmul_dtype=None):
    """Fold LayerNorm's affine into the Linear (exact in f32).

        (xn * gamma + beta) @ W + b == xn @ (gamma[:, None] * W) + (beta @ W + b)

    Call once per weight update (hoisted out of the per-call hot path).
    w_t is (C_in, C_out) so the kernel computes xn @ w_t (== torch xn @ W.T + b).
    Returns (w_fold: (C, C) in matmul_dtype, b_fold: (1, C) f32).
    """
    if matmul_dtype is None:
        matmul_dtype = _default_matmul_dtype(int(w_t.shape[0]))
    w_f32 = w_t.astype(jnp.float32)
    w_fold = (gamma.astype(jnp.float32)[:, None] * w_f32).astype(matmul_dtype)
    b_fold = (beta.astype(jnp.float32) @ w_f32
              + b.astype(jnp.float32)).reshape(1, -1)
    return w_fold, b_fold


def prenorm_linear(x, w_fold, b_fold, *, tm=1024):
    """Fused Linear(LayerNorm(x)) == PreNorm(dim, nn.Linear(dim, dim))(x).

    x: (..., C).  w_fold: (C, C) folded weight (see fold_prenorm_linear_params).
    b_fold: (1, C) folded bias in f32.
    """
    orig_shape = x.shape
    C = int(orig_shape[-1])
    rows = 1
    for d in orig_shape[:-1]:
        rows *= int(d)
    x2d = x.reshape(rows, C)                       # view; no extra HBM copy

    x_itemsize = jnp.dtype(x.dtype).itemsize
    w_itemsize = jnp.dtype(w_fold.dtype).itemsize
    sub = {4: 8, 2: 16, 1: 32}.get(x_itemsize, 8)  # sublane packing of x/out
    cap = _vmem_cap_bytes()

    # Output-column tiling only when C is lane-aligned AND the resident W'
    # would eat too much VMEM (v7x, large C); otherwise one full-width strip.
    # (LN stats are recomputed per column strip — cheap VPU work vs. the GEMM.)
    tn = C
    if C % 128 == 0:
        while tn > 512 and 2 * C * tn * w_itemsize > cap // 3:
            tn = tn // 2
            if tn % 128 != 0:
                tn = 128
    n_col = pl.cdiv(C, tn)

    # Row tile: as big as the VMEM budget allows (amortizes grid-step
    # overhead); megacore shards the row axis.
    tm = min(_round_up(tm, sub), _round_up(rows, sub))
    while tm > sub and _vmem_estimate_bytes(tm, C, tn, x_itemsize, w_itemsize) > cap:
        tm = max(sub, _round_up(tm // 2, sub))
    n_row = pl.cdiv(rows, tm)

    cost = pl.CostEstimate(
        flops=2 * rows * C * C + 8 * rows * C,
        transcendentals=rows,
        bytes_accessed=rows * C * 2 * x_itemsize + C * C * w_itemsize + C * 4,
    )

    out2d = pl.pallas_call(
        prenorm_kernel,
        out_shape=jax.ShapeDtypeStruct((rows, C), x.dtype),
        grid=(n_row, n_col),
        in_specs=[
            pl.BlockSpec((tm, C), lambda i, j: (i, 0)),   # x row tile (reused over j)
            pl.BlockSpec((C, tn), lambda i, j: (0, j)),   # folded weight strip
            pl.BlockSpec((1, tn), lambda i, j: (0, j)),   # folded bias strip
        ],
        out_specs=pl.BlockSpec((tm, tn), lambda i, j: (i, j)),
        compiler_params=pltpu.CompilerParams(
            dimension_semantics=("parallel", "parallel"),
            vmem_limit_bytes=int(cap),
        ),
        cost_estimate=cost,
    )(x2d, w_fold, b_fold)

    return out2d.reshape(orig_shape)


def reference(x, gamma, beta, w_t, b):
    x32 = x.astype(jnp.float32)
    mean = jnp.mean(x32, axis=-1, keepdims=True)
    var = jnp.mean((x32 - mean) ** 2, axis=-1, keepdims=True)
    xn = (x32 - mean) / jnp.sqrt(var + LN_EPS)
    xn = xn * gamma + beta
    return (xn @ w_t + b).astype(x.dtype)


if __name__ == "__main__":
    key = jax.random.PRNGKey(0)
    B, T, C = 2, 8, 32  # batch, tokens, dim

    kx, kw, kb = jax.random.split(key, 3)
    x = jax.random.normal(kx, (B, T, C), dtype=jnp.float32)

    # LayerNorm params: PyTorch default init (gamma = ones, beta = zeros).
    gamma = jnp.ones((C,), dtype=jnp.float32)
    beta = jnp.zeros((C,), dtype=jnp.float32)

    # fn = Linear(C, C): deterministic synthetic init, stored as (C_in, C_out)
    # so the kernel computes xn @ w_t (== torch's xn @ weight.T + bias).
    # TODO(synk): PreNorm wraps an arbitrary `fn`; other choices of fn need
    # their own fused kernels.
    w_t = jax.random.normal(kw, (C, C), dtype=jnp.float32) * 0.05
    b = jax.random.normal(kb, (C,), dtype=jnp.float32) * 0.05

    # Fold once (hoisted out of the per-call hot path). Small C -> f32 GEMM
    # operands so the tight allclose tolerance against the f32 reference holds.
    w_fold, b_fold = fold_prenorm_linear_params(
        gamma, beta, w_t, b, matmul_dtype=jnp.float32)

    out = prenorm_linear(x, w_fold, b_fold)
    out = jax.block_until_ready(out)

    ref = reference(x, gamma, beta, w_t, b)
    assert out.shape == (B, T, C)
    assert jnp.allclose(out, ref, atol=2e-5, rtol=2e-5), "mismatch vs reference"

    print("KERNEL_OK")
</pallas_src>

<mosaic_0001>
module attributes {stable_mosaic.version = 11 : i64} {
  func.func @prenorm_kernel(%arg0: i32, %arg1: i32, %arg2: memref<16x32xf32, #tpu.memory_space<vmem>>, %arg3: memref<32x32xf32, #tpu.memory_space<vmem>>, %arg4: memref<1x32xf32, #tpu.memory_space<vmem>>, %arg5: memref<16x32xf32, #tpu.memory_space<vmem>>) attributes {dimension_semantics = [#tpu.dimension_semantics<parallel>, #tpu.dimension_semantics<parallel>], iteration_bounds = array<i64: 1, 1>, scalar_prefetch = 0 : i64, scratch_operands = 0 : i64, tpu.core_type = #tpu.core_type<tc>, window_params = [{transform_indices = @transform_0, window_bounds = array<i64: 16, 32>}, {transform_indices = @transform_1, window_bounds = array<i64: 32, 32>}, {transform_indices = @transform_2, window_bounds = array<i64: 1, 32>}, {transform_indices = @transform_3, window_bounds = array<i64: 16, 32>}]} {
    %c0 = arith.constant 0 : index
    %c0_0 = arith.constant 0 : index
    %0 = vector.load %arg2[%c0, %c0_0] : memref<16x32xf32, #tpu.memory_space<vmem>>, vector<16x32xf32>
    %cst = arith.constant dense<0.000000e+00> : vector<16xf32>
    %1 = vector.multi_reduction <add>, %0, %cst [1] : vector<16x32xf32> to vector<16xf32>
    %2 = vector.shape_cast %1 : vector<16xf32> to vector<16x1xf32>
    %cst_1 = arith.constant 3.125000e-02 : f32
    %3 = vector.broadcast %cst_1 : f32 to vector<16x1xf32>
    %4 = arith.mulf %2, %3 : vector<16x1xf32>
    %5 = vector.broadcast %4 : vector<16x1xf32> to vector<16x32xf32>
    %6 = arith.subf %0, %5 : vector<16x32xf32>
    %7 = arith.mulf %6, %6 : vector<16x32xf32>
    %cst_2 = arith.constant dense<0.000000e+00> : vector<16xf32>
    %8 = vector.multi_reduction <add>, %7, %cst_2 [1] : vector<16x32xf32> to vector<16xf32>
    %9 = vector.shape_cast %8 : vector<16xf32> to vector<16x1xf32>
    %cst_3 = arith.constant 3.125000e-02 : f32
    %10 = vector.broadcast %cst_3 : f32 to vector<16x1xf32>
    %11 = arith.mulf %9, %10 : vector<16x1xf32>
    %cst_4 = arith.constant 9.99999974E-6 : f32
    %12 = vector.broadcast %cst_4 : f32 to vector<16x1xf32>
    %13 = arith.addf %11, %12 : vector<16x1xf32>
    %14 = math.rsqrt %13 : vector<16x1xf32>
    %15 = vector.broadcast %14 : vector<16x1xf32> to vector<16x32xf32>
    %16 = arith.mulf %6, %15 : vector<16x32xf32>
    %c0_5 = arith.constant 0 : index
    %c0_6 = arith.constant 0 : index
    %17 = vector.load %arg3[%c0_5, %c0_6] : memref<32x32xf32, #tpu.memory_space<vmem>>, vector<32x32xf32>
    %cst_7 = arith.constant dense<0.000000e+00> : vector<16x32xf32>
    %18 = tpu.matmul %16, %17, %cst_7 {dimension_numbers = #tpu.dot_dimension_numbers<[1], [0], [0], [1], [0, 0, 1, 1], [], []>} : vector<16x32xf32>, vector<32x32xf32>, vector<16x32xf32> -> vector<16x32xf32>
    %c0_8 = arith.constant 0 : index
    %c0_9 = arith.constant 0 : index
    %19 = vector.load %arg4[%c0_8, %c0_9] : memref<1x32xf32, #tpu.memory_space<vmem>>, vector<1x32xf32>
    %20 = vector.broadcast %19 : vector<1x32xf32> to vector<16x32xf32>
    %21 = arith.addf %18, %20 : vector<16x32xf32>
    %c0_10 = arith.constant 0 : index
    %c0_11 = arith.constant 0 : index
    %22 = vector.load %arg5[%c0_10, %c0_11] : memref<16x32xf32, #tpu.memory_space<vmem>>, vector<16x32xf32>
    tpu.vector_store %arg5[%c0_10, %c0_11], %21 {strides = array<i32>} : memref<16x32xf32, #tpu.memory_space<vmem>>, vector<16x32xf32>,
    return
  }
  func.func @transform_0(%arg0: i32, %arg1: i32) -> (i32, i32) {
    %c0_i32 = arith.constant 0 : i32
    %c0_i32_0 = arith.constant 0 : i32
    return %arg0, %c0_i32 : i32, i32
  }
  func.func @transform_1(%arg0: i32, %arg1: i32) -> (i32, i32) {
    %c0_i32 = arith.constant 0 : i32
    %c0_i32_0 = arith.constant 0 : i32
    return %c0_i32, %arg1 : i32, i32
  }
  func.func @transform_2(%arg0: i32, %arg1: i32) -> (i32, i32) {
    %c0_i32 = arith.constant 0 : i32
    %c0_i32_0 = arith.constant 0 : i32
    return %c0_i32, %arg1 : i32, i32
  }
  func.func @transform_3(%arg0: i32, %arg1: i32) -> (i32, i32) {
    %c0_i32 = arith.constant 0 : i32
    return %arg0, %arg1 : i32, i32
  }
}

</mosaic_0001>

<bundles_post_ra>
// kernel: tpu_custom_call.1
= control target key start
LH: loop header
LB: loop body
LE: loop exit
PB: predicated region body
PF: predicated region fallthrough
CT: control target
= control target key end

     0   :  { %8 = vsyncpa [#allocation3], 0  ;;  %s374_s0 = inlined_call_operand.hbm [shape: f32[16,32], index: 0, kind: input, shape index: {}]   ;;  %s375_s1 = inlined_call_operand.hbm [shape: f32[32,32], index: 1, kind: input, shape index: {}]   ;;  %s376_s2 = inlined_call_operand.vmem [shape: f32[1,32], index: 2, kind: input, shape index: {}]   ;;  %s377_s3 = inlined_call_operand.hbm [shape: f32[16,32], index: 3, kind: output, shape index: {}]  }
   0x1   :  { %9 = vsyncpa [#allocation6], 0 }
   0x2   :  { %10 = vsyncpa [#allocation4], 0  ;;  %s293_s12 = smov [#allocation2]   ;;  %s221_s16 = scalar_lea.hbm %s374_s0, 256 }
   0x3   :  { %s16_s13 = sshll.u32 %s293_s12, 4  ;;  %p222_p0 = scmp.ne.s32.totalorder %s374_s0, %s221_s16  ;;  %s17_s13 = int_to_ptr.vmem [resolvable:$true] %s16_s13 }
   0x4   :  { %p225_p1 = scmp.lt.u32.totalorder %s221_s16, %s374_s0 }
   0x6   :  { %p227_p2 = pnand %p225_p1, %p222_p0 }
   0x8   :  { %230 = shalt.err (!%p227_p2)
}
   0x9   :  { %s231_s21 = scalar_lea.vmem %s17_s13, 256  ;;  %p236_p4 = scmp.lt.s32.totalorder %s17_s13, %s17_s13 }
   0xa   :  { %p232_p3 = scmp.ne.s32.totalorder %s17_s13, %s231_s21  ;;  %p237_p5 = scmp.lt.s32.totalorder %s231_s21, %s231_s21 }
   0xc   :  { %p238_p6 = por %p237_p5, %p236_p4 }
   0xe   :  { %p239_p7 = pnand %p238_p6, %p232_p3 }
  0x10   :  { %242 = shalt.err (!%p239_p7)
}
  0x11   :  { %s294_s22 = smov 128   ;;  %s295_s23 = smov 8  }
  0x12   :  { %22 = dma.hbm_to_vmem [thread:$0]  %s374_s0, 256, %s17_s13, [#allocation3], %s294_s22, %s294_s22, %s295_s23  }
  0x13   :  { %s296_s26 = smov [#allocation5]   ;;  %s243_s30 = scalar_lea.hbm %s375_s1, 512 }
  0x14   :  { %s28_s27 = sshll.u32 %s296_s26, 4  ;;  %p244_p8 = scmp.ne.s32.totalorder %s375_s1, %s243_s30  ;;  %s29_s27 = int_to_ptr.vmem [resolvable:$true] %s28_s27 }
  0x15   :  { %p247_p9 = scmp.lt.u32.totalorder %s243_s30, %s375_s1 }
  0x17   :  { %p249_p10 = pnand %p247_p9, %p244_p8 }
  0x19   :  { %252 = shalt.err (!%p249_p10)
}
  0x1a   :  { %s253_s8 = scalar_lea.vmem %s29_s27, 512  ;;  %p258_p12 = scmp.lt.s32.totalorder %s29_s27, %s29_s27 }
  0x1b   :  { %p254_p11 = scmp.ne.s32.totalorder %s29_s27, %s253_s8  ;;  %p259_p13 = scmp.lt.s32.totalorder %s253_s8, %s253_s8 }
  0x1d   :  { %p260_p0 = por %p259_p13, %p258_p12 }
  0x1f   :  { %p261_p1 = pnand %p260_p0, %p254_p11 }
  0x21   :  { %264 = shalt.err (!%p261_p1)
}
  0x22   :  { %34 = dma.hbm_to_vmem [thread:$0]  %s375_s1, 512, %s29_s27, [#allocation6], %s294_s22, %s294_s22, %s295_s23  }
  0x23   :  { %287 = dma.done.wait [#allocation3], 256  }
  0x24   :  { %288 = vsyncadd [#allocation3], 4294967040 }
  0x25   :  { %289 = dma.done.wait [#allocation6], 512  }
  0x26   :  { %290 = vsyncadd [#allocation6], 4294966784  ;;  %vm45_vm0 = vcmask 261120   ;;  %v43_v0 = vld [vmem:[#allocation2] sm:$0xff]  ;;  %v44_v1 = vld [vmem:[#allocation2 + $0x8] sm:$0xff]  ;;  %s297_s11 = smov [#allocation7]  }
  0x27   :  { %v46_v2 = vsel %vm45_vm0, %v43_v0, 0.0  ;;  %v49_v3 = vsel %vm45_vm0, %v44_v1, 0.0  ;;  %v72_v14 = vld [vmem:[#allocation5] sm:$0xff]  ;;  %v73_v15 = vld [vmem:[#allocation5 + $0x8] sm:$0xff]  ;;  %v74_v16 = vld [vmem:[#allocation5 + $0x10] sm:$0xff]  ;;  %s171_s12 = sshll.u32 %s297_s11, 4  ;;  %s172_s12 = int_to_ptr.vmem [resolvable:$true] %s171_s12 }
  0x28   :  { %47 = vadd.xlane.f32.xlu0 %v46_v2  ;;  %v204_v17 = vpack.c.bf16 %v73_v15, %v72_v14  ;;  %v75_v18 = vld [vmem:[#allocation5 + $0x18] sm:$0xff]  ;;  %v184_v30 = vld [vmem:[%s376_s2] ss:$0 sm:$0xff]  ;;  %s265_s13 = scalar_lea.vmem %s172_s12, 256  ;;  %p270_p3 = scmp.lt.s32.totalorder %s172_s12, %s172_s12 }
  0x29   :  { %v208_v19 = vpack.c.bf16 %v75_v18, %v74_v16  ;;  %p266_p2 = scmp.ne.s32.totalorder %s172_s12, %s265_s13  ;;  %p271_p4 = scmp.lt.s32.totalorder %s265_s13, %s265_s13 }
  0x2a   :  { %205 = vmatprep.subr.bf16.mxu0 %v204_v17 }
  0x2b   :  { %207 = vmatpush3.bf16.msra.mxu0 %v204_v17  ;;  %p272_p5 = por %p271_p4, %p270_p3 }
  0x2c   :  { %50 = vadd.xlane.f32.xlu0 %v49_v3  ;;  %209 = vmatprep.subr.bf16.mxu0 %v208_v19 }
  0x2d   :  { %p273_p6 = pnand %p272_p5, %p266_p2 }
  0x2f   :  { %211 = vmatpush3.bf16.msra.mxu0 %v208_v19 }
  0xb5   :  { %v48_v4 = vpop.xlane.xlu0 %47 }
  0xb6   :  { %v52_v5 = vmul.f32 0.03125, %v48_v4 }
  0xb8   :  { %v54_v6 = vsub.f32 %v43_v0, %v52_v5 }
  0xb9   :  { %v51_v7 = vpop.xlane.xlu0 %50 }
  0xba   :  { %v53_v8 = vmul.f32 0.03125, %v51_v7  ;;  %v56_v9 = vmul.f32 %v54_v6, %v54_v6 }
  0xbc   :  { %v55_v10 = vsub.f32 %v44_v1, %v53_v8  ;;  %v58_v11 = vsel %vm45_vm0, %v56_v9, 0.0 }
  0xbd   :  { %59 = vadd.xlane.f32.xlu1 %v58_v11 }
  0xbe   :  { %v57_v12 = vmul.f32 %v55_v10, %v55_v10 }
  0xc0   :  { %v61_v13 = vsel %vm45_vm0, %v57_v12, 0.0 }
  0xc1   :  { %62 = vadd.xlane.f32.xlu1 %v61_v13 }
 0x14a   :  { %v60_v20 = vpop.xlane.xlu1 %59 }
 0x14b   :  { %v64_v21 = vmul.f32 0.03125, %v60_v20 }
 0x14d   :  { %v66_v22 = vadd.f32 1e-05, %v64_v21 }
 0x14e   :  { %v63_v23 = vpop.xlane.xlu1 %62 }
 0x14f   :  { %217 = vrsqrt.f32 %v66_v22  ;;  %v65_v24 = vmul.f32 0.03125, %v63_v23 }
 0x151   :  { %v67_v25 = vadd.f32 1e-05, %v65_v24 }
 0x153   :  { %219 = vrsqrt.f32 %v67_v25 }
 0x159   :  { %v218_v26 = vpop.eup %217 }
 0x15a   :  { %v70_v27 = vmul.f32 %v218_v26, %v54_v6 }
 0x15c   :  { %201 = vmatprep.mubr.msk.f32.mxu0 %vm45_vm0, %v70_v27 }
 0x15d   :  { %v220_v28 = vpop.eup %219 }
 0x15e   :  { %v71_v29 = vmul.f32 %v220_v28, %v55_v10 }
 0x160   :  { %202 = vmatmul.mubr.msk.f32.vlgmr.msra.gmra.mrb[0].mxu0 %vm45_vm0, %v71_v29 }
 0x233   :  { %v203_v31 = vpop.f32.mrb[0].mxu0 }
 0x234   :  { %v161_v32 = vadd.f32 %v203_v31, %v184_v30  ;;  %v155_v33 = vpop.f32.mrb[1].mxu0 }
 0x235   :  { %v156_v34 = vadd.f32 %v184_v30, %v155_v33 }
 0x236   :  { %165 = vst.msk [vmem:[#allocation7 + $0x8] sm:$0xff] %vm45_vm0, %v161_v32 }
 0x237   :  { %164 = vst.msk [vmem:[#allocation7] sm:$0xff] %vm45_vm0, %v156_v34 }
 0x238   :  { %276 = shalt.err (!%p273_p6)
}
 0x239   :  { %s277_s15 = scalar_lea.hbm %s377_s3, 256 }
 0x23a   :  { %p278_p7 = scmp.ne.s32.totalorder %s377_s3, %s277_s15  ;;  %p281_p8 = scmp.lt.u32.totalorder %s277_s15, %s377_s3 }
 0x23c   :  { %p283_p9 = pnand %p281_p8, %p278_p7 }
 0x23e   :  { %286 = shalt.err (!%p283_p9)
}
 0x23f   :  { %177 = dma.vmem_to_hbm [thread:$0]  %s172_s12, 256, %s377_s3, [#allocation4], %s294_s22, %s294_s22, %s295_s23  }
 0x240   :  { %291 = dma.done.wait [#allocation4], 256  }
 0x241   :  { %292 = vsyncadd [#allocation4], 4294967040 }
 0x242   :  { %181 = vsyncpa [#allocation3], 1 }
 0x243   :  { %182 = vsyncpa [#allocation6], 1 }
 0x244   :  { %183 = vsyncpa [#allocation4], 1 }

</bundles_post_ra>
